<compile_context>
chip_gen: v7x
topology: tpu7x:2x2x1
jax: 0.10.0
libtpu: 0.0.40
codegen_flags: <defaults>
</compile_context>

<pallas_src>
import functools

import jax
import jax.numpy as jnp
from jax import lax
from jax.experimental import pallas as pl
from jax.experimental.pallas import tpu as pltpu

IN_FEATURES = 10
HIDDEN = 100
OUT_FEATURES = 1
TILE_B = 8192    # batch lanes per grid step (tuning knob); multiple of 256 (v6e/v7x MXU)
MIN_TILE_B = 256


def mlp_kernel(x_ref, w1_ref, b1_ref, w2_ref, b2_ref, o_ref):
    # x_ref : [TILE_B, IN_FEATURES]  natural [batch, feature] layout, pipelined over grid
    # w1_ref: [HIDDEN, IN_FEATURES]  fc1.weight (PyTorch [out, in]), bf16, resident
    # b1_ref: [HIDDEN, 1]            fc1.bias column, f32, resident
    # w2_ref: [OUT_FEATURES, HIDDEN] fc2.weight, f32, resident
    # b2_ref: [1, 1]                 fc2.bias scalar in SMEM
    # o_ref : [OUT_FEATURES, TILE_B] lane-dense output tile
    x = x_ref[...].astype(jnp.bfloat16)                    # in-kernel cast (no wrapper copy)
    # h = W1 @ x^T : contract dim 1 of both operands -> [HIDDEN, TILE_B] (batch on lanes)
    h = lax.dot_general(
        w1_ref[...], x,
        dimension_numbers=(((1,), (1,)), ((), ())),
        preferred_element_type=jnp.float32,
    )
    h = jnp.maximum(h + b1_ref[...], 0.0)                  # bias + ReLU, [HIDDEN, TILE_B]
    out = jnp.dot(w2_ref[...], h, preferred_element_type=jnp.float32)   # [1, TILE_B]
    o_ref[...] = (out + b2_ref[0, 0]).astype(o_ref.dtype)


def _choose_tile_b(batch, max_tile=TILE_B, min_tile=MIN_TILE_B):
    """Pick the batch tile: as large as possible, but keep >= 2 grid steps when the
    batch allows it (v7x megacore), and never larger than the batch itself."""
    tb = max_tile
    while tb > min_tile and pl.cdiv(batch, tb) < 2:
        tb //= 2
    if batch < tb:
        tb = batch          # single block equal to the full (small) batch dim
    return tb


@functools.partial(jax.jit, static_argnames=("tile_b",))
def simple_nn_forward(x, w1, b1, w2, b2, *, tile_b=TILE_B):
    """Forward pass of SimpleNN.

    x : [B, 10]   (float32, natural layout — passed to the kernel with zero wrapper copies)
    w1: [100, 10] (PyTorch fc1.weight layout), b1: [100]
    w2: [1, 100]  (PyTorch fc2.weight layout), b2: [1]
    returns [B, 1] float32
    """
    B = x.shape[0]
    tb = _choose_tile_b(B, max_tile=tile_b)
    grid = (pl.cdiv(B, tb),)

    # Tiny parameter prep (weights are ~45 KB total; x itself is untouched).
    w1b = w1.astype(jnp.bfloat16)                      # bf16 operand for the fc1 MXU dot
    b1c = b1.reshape(HIDDEN, 1).astype(jnp.float32)
    w2f = w2.astype(jnp.float32)
    b2s = b2.reshape(1, 1).astype(jnp.float32)

    outT = pl.pallas_call(
        mlp_kernel,
        out_shape=jax.ShapeDtypeStruct((OUT_FEATURES, B), jnp.float32),
        grid=grid,
        in_specs=[
            pl.BlockSpec((tb, IN_FEATURES), lambda i: (i, 0)),        # x tile (pipelined)
            pl.BlockSpec((HIDDEN, IN_FEATURES), lambda i: (0, 0)),    # w1 resident
            pl.BlockSpec((HIDDEN, 1), lambda i: (0, 0)),              # b1 resident
            pl.BlockSpec((OUT_FEATURES, HIDDEN), lambda i: (0, 0)),   # w2 resident
            pl.BlockSpec(memory_space=pltpu.MemorySpace.SMEM),        # b2 scalar in SMEM
        ],
        out_specs=pl.BlockSpec((OUT_FEATURES, tb), lambda i: (0, i)), # lane-dense output
        compiler_params=pltpu.CompilerParams(
            dimension_semantics=("parallel",),      # shard batch grid across TCs on v7x
            vmem_limit_bytes=32 * 1024 * 1024,      # accept the large tiles on v5e too
        ),
    )(x.astype(jnp.float32), w1b, b1c, w2f, b2s)

    return outT.reshape(B, OUT_FEATURES)


def init_params(key):
    """Deterministic init mirroring nn.Linear default (uniform +/- 1/sqrt(fan_in)),
    stored in PyTorch's native [out_features, in_features] layout."""
    k1, k2, k3, k4 = jax.random.split(key, 4)
    bound1 = 1.0 / jnp.sqrt(float(IN_FEATURES))
    bound2 = 1.0 / jnp.sqrt(float(HIDDEN))
    w1 = jax.random.uniform(k1, (HIDDEN, IN_FEATURES), jnp.float32, -bound1, bound1)
    b1 = jax.random.uniform(k2, (HIDDEN,), jnp.float32, -bound1, bound1)
    w2 = jax.random.uniform(k3, (OUT_FEATURES, HIDDEN), jnp.float32, -bound2, bound2)
    b2 = jax.random.uniform(k4, (OUT_FEATURES,), jnp.float32, -bound2, bound2)
    return w1, b1, w2, b2


def _reference_f32(x, w1, b1, w2, b2):
    # Exact f32 reference of the PyTorch forward: relu(x @ W1.T + b1) @ W2.T + b2
    return jnp.maximum(x @ w1.T + b1, 0.0) @ w2.T + b2


def _reference_bf16(x, w1, b1, w2, b2):
    # Precision-matched reference (bf16 fc1 operands, f32 accumulation), for tight checks.
    h = jnp.dot(x.astype(jnp.bfloat16), w1.astype(jnp.bfloat16).T,
                preferred_element_type=jnp.float32) + b1
    h = jnp.maximum(h, 0.0)
    return jnp.dot(h, w2.T, preferred_element_type=jnp.float32) + b2


if __name__ == "__main__":
    key = jax.random.PRNGKey(0)
    kx, kp = jax.random.split(key)
    w1, b1, w2, b2 = init_params(kp)

    # Small batch (single block, block == full batch dim).
    batch = 8
    x = jax.random.normal(kx, (batch, IN_FEATURES), jnp.float32)
    out = jax.block_until_ready(simple_nn_forward(x, w1, b1, w2, b2))
    assert out.shape == (batch, OUT_FEATURES)
    assert jnp.allclose(out, _reference_bf16(x, w1, b1, w2, b2), atol=2e-3, rtol=2e-3)
    assert jnp.allclose(out, _reference_f32(x, w1, b1, w2, b2), atol=3e-2, rtol=3e-2)

    # Larger, non-tile-multiple batch: multi-step grid + ragged final block.
    batch2 = 520
    x2 = jax.random.normal(jax.random.fold_in(kx, 1), (batch2, IN_FEATURES), jnp.float32)
    out2 = jax.block_until_ready(simple_nn_forward(x2, w1, b1, w2, b2))
    assert out2.shape == (batch2, OUT_FEATURES)
    assert jnp.allclose(out2, _reference_bf16(x2, w1, b1, w2, b2), atol=2e-3, rtol=2e-3)
    assert jnp.allclose(out2, _reference_f32(x2, w1, b1, w2, b2), atol=3e-2, rtol=3e-2)

    print("KERNEL_OK")
</pallas_src>

<mosaic_0001>
module attributes {stable_mosaic.version = 11 : i64} {
  func.func @mlp_kernel(%arg0: i32, %arg1: memref<8x10xf32, #tpu.memory_space<vmem>>, %arg2: memref<100x10xbf16, #tpu.memory_space<vmem>>, %arg3: memref<100x1xf32, #tpu.memory_space<vmem>>, %arg4: memref<1x100xf32, #tpu.memory_space<vmem>>, %arg5: memref<1x1xf32, #tpu.memory_space<smem>>, %arg6: memref<1x8xf32, #tpu.memory_space<vmem>>) attributes {dimension_semantics = [#tpu.dimension_semantics<parallel>], iteration_bounds = array<i64: 1>, scalar_prefetch = 0 : i64, scratch_operands = 0 : i64, tpu.core_type = #tpu.core_type<tc>, window_params = [{transform_indices = @transform_0, window_bounds = array<i64: 8, 10>}, {pipeline_mode = #tpu.pipeline_mode<synchronous>, transform_indices = @transform_1, window_bounds = array<i64: 100, 10>}, {pipeline_mode = #tpu.pipeline_mode<synchronous>, transform_indices = @transform_2, window_bounds = array<i64: 100, 1>}, {pipeline_mode = #tpu.pipeline_mode<synchronous>, transform_indices = @transform_3, window_bounds = array<i64: 1, 100>}, {transform_indices = @transform_4, window_bounds = array<i64: 1, 1>}, {transform_indices = @transform_5, window_bounds = array<i64: 1, 8>}]} {
    %c0 = arith.constant 0 : index
    %c0_0 = arith.constant 0 : index
    %0 = vector.load %arg1[%c0, %c0_0] : memref<8x10xf32, #tpu.memory_space<vmem>>, vector<8x10xf32>
    %1 = arith.truncf %0 : vector<8x10xf32> to vector<8x10xbf16>
    %c0_1 = arith.constant 0 : index
    %c0_2 = arith.constant 0 : index
    %2 = vector.load %arg2[%c0_1, %c0_2] : memref<100x10xbf16, #tpu.memory_space<vmem>>, vector<100x10xbf16>
    %cst = arith.constant dense<0.000000e+00> : vector<100x8xf32>
    %3 = tpu.matmul %2, %1, %cst {dimension_numbers = #tpu.dot_dimension_numbers<[1], [1], [0], [0], [0, 0, 1, 0], [], []>} : vector<100x10xbf16>, vector<8x10xbf16>, vector<100x8xf32> -> vector<100x8xf32>
    %c0_3 = arith.constant 0 : index
    %c0_4 = arith.constant 0 : index
    %4 = vector.load %arg3[%c0_3, %c0_4] : memref<100x1xf32, #tpu.memory_space<vmem>>, vector<100x1xf32>
    %5 = vector.broadcast %4 : vector<100x1xf32> to vector<100x8xf32>
    %6 = arith.addf %3, %5 : vector<100x8xf32>
    %cst_5 = arith.constant 0.000000e+00 : f32
    %7 = vector.broadcast %cst_5 : f32 to vector<100x8xf32>
    %8 = arith.maximumf %6, %7 : vector<100x8xf32>
    %c0_6 = arith.constant 0 : index
    %c0_7 = arith.constant 0 : index
    %9 = vector.load %arg4[%c0_6, %c0_7] : memref<1x100xf32, #tpu.memory_space<vmem>>, vector<1x100xf32>
    %cst_8 = arith.constant dense<0.000000e+00> : vector<1x8xf32>
    %10 = tpu.matmul %9, %8, %cst_8 {dimension_numbers = #tpu.dot_dimension_numbers<[1], [0], [0], [1], [0, 0, 1, 1], [], []>} : vector<1x100xf32>, vector<100x8xf32>, vector<1x8xf32> -> vector<1x8xf32>
    %c0_9 = arith.constant 0 : index
    %c0_10 = arith.constant 0 : index
    %11 = memref.load %arg5[%c0_9, %c0_10] : memref<1x1xf32, #tpu.memory_space<smem>>
    %12 = vector.broadcast %11 : f32 to vector<1x8xf32>
    %13 = arith.addf %10, %12 : vector<1x8xf32>
    %c0_11 = arith.constant 0 : index
    %c0_12 = arith.constant 0 : index
    %14 = vector.load %arg6[%c0_11, %c0_12] : memref<1x8xf32, #tpu.memory_space<vmem>>, vector<1x8xf32>
    tpu.vector_store %arg6[%c0_11, %c0_12], %13 {strides = array<i32>} : memref<1x8xf32, #tpu.memory_space<vmem>>, vector<1x8xf32>,
    return
  }
  func.func @transform_0(%arg0: i32) -> (i32, i32) {
    %c0_i32 = arith.constant 0 : i32
    %c0_i32_0 = arith.constant 0 : i32
    return %arg0, %c0_i32 : i32, i32
  }
  func.func @transform_1(%arg0: i32) -> (i32, i32) {
    %c0_i32 = arith.constant 0 : i32
    %c0_i32_0 = arith.constant 0 : i32
    %c0_i32_1 = arith.constant 0 : i32
    return %c0_i32, %c0_i32_0 : i32, i32
  }
  func.func @transform_2(%arg0: i32) -> (i32, i32) {
    %c0_i32 = arith.constant 0 : i32
    %c0_i32_0 = arith.constant 0 : i32
    %c0_i32_1 = arith.constant 0 : i32
    return %c0_i32, %c0_i32_0 : i32, i32
  }
  func.func @transform_3(%arg0: i32) -> (i32, i32) {
    %c0_i32 = arith.constant 0 : i32
    %c0_i32_0 = arith.constant 0 : i32
    %c0_i32_1 = arith.constant 0 : i32
    return %c0_i32, %c0_i32_0 : i32, i32
  }
  func.func @transform_4(%arg0: i32) -> (i32, i32) {
    %c0_i32 = arith.constant 0 : i32
    %c0_i32_0 = arith.constant 0 : i32
    %c0_i32_1 = arith.constant 0 : i32
    return %c0_i32, %c0_i32_0 : i32, i32
  }
  func.func @transform_5(%arg0: i32) -> (i32, i32) {
    %c0_i32 = arith.constant 0 : i32
    %c0_i32_0 = arith.constant 0 : i32
    return %c0_i32, %arg0 : i32, i32
  }
}

</mosaic_0001>

<bundles_post_ra>
// kernel: simple_nn_forward.1
= control target key start
LH: loop header
LB: loop body
LE: loop exit
PB: predicated region body
PF: predicated region fallthrough
CT: control target
= control target key end

     0   :  { %vm149_vm0 = vcmask 80896   ;;  %v527_v1 = vmov 0.0   ;;  %vm528_vm1 = vmmov 0   ;;  %v529_v4 = vmov 0   ;;  %s679_s0 = inlined_call_operand.vmem [shape: f32[8,10], index: 0, kind: input, shape index: {}]   ;;  %s680_s1 = inlined_call_operand.vmem [shape: bf16[100,10], index: 1, kind: input, shape index: {}]   ;;  %s681_s2 = inlined_call_operand.vmem [shape: f32[100,1], index: 2, kind: input, shape index: {}]   ;;  %s682_s3 = inlined_call_operand.vmem [shape: f32[1,100], index: 3, kind: input, shape index: {}]   ;;  %s683_s4 = inlined_call_operand.<no memory space> [shape: f32[1,1], index: 4, kind: input, shape index: {}]   ;;  %s684_s5 = inlined_call_operand.hbm [shape: f32[1,8], index: 5, kind: output, shape index: {}]  }
   0x1   :  { %v23_v0 = vld [vmem:[%s679_s0] sm:$0xff]  ;;  %410 = vmatprep.subr.bf16.mxu0 %v527_v1  ;;  %487 = vmatprep.subr.bf16.mxu1 %v527_v1  ;;  %v40_v8 = vld [vmem:[%s681_s2 + $0x10] sm:$0xff]  ;;  %v39_v9 = vld [vmem:[%s681_s2 + $0x8] sm:$0xff] }
   0x2   :  { %v24_v2 = vpack.c.bf16 %v23_v0, %v23_v0  ;;  %412 = vmatprep.mubr.msk.bf16.mxu0 %vm528_vm1, %v527_v1  ;;  %428 = vmatprep.mubr.msk.bf16.mxu1 %vm528_vm1, %v527_v1  ;;  %v496_v5 = vld [vmem:[%s680_s1] sm:$0xff]   ;;  %v41_v10 = vld [vmem:[%s681_s2 + $0x18] sm:$0xff] }
   0x3   :  { %494 = vset.pattern.permute.xlu0 %v529_v4  ;;  %495 = vset.pattern.permute.xlu1 %v529_v4  ;;  %v497_v6 = vld [vmem:[%s680_s1 + $0x20] sm:$0xff]  }
   0x4   :  { %v172_v3 = vsel %vm149_vm0, %v24_v2, 0  ;;  %v38_v7 = vld [vmem:[%s681_s2] sm:$0xff]  ;;  %63 = vperm.xlu1 %495, %v40_v8  }
   0x5   :  { %411 = vmatpush3.bf16.xpose.msra.mxu0 %v172_v3  ;;  %488 = vmatpush3.bf16.xpose.msra.mxu1 %v172_v3 }
   0x6   :  { %53 = vperm.xlu0 %494, %v38_v7  }
   0xc   :  { %413 = vmatmul.mubr.msk.bf16.vlgmr.msra.gmra.mrb[0].mxu0 %vm149_vm0, %v496_v5  ;;  %429 = vmatmul.mubr.msk.bf16.vlgmr.msra.gmra.mrb[0].mxu1 %vm149_vm0, %v497_v6 }
   0xd   :  { %11 = vsyncpa [#allocation4], 0  ;;  %416 = vmatprep.mubr.msk.bf16.mxu0 %vm528_vm1, %v527_v1  ;;  %432 = vmatprep.mubr.msk.bf16.mxu1 %vm528_vm1, %v527_v1  ;;  %v42_v11 = vld [vmem:[%s681_s2 + $0x20] sm:$0xff]  ;;  %v43_v12 = vld [vmem:[%s681_s2 + $0x28] sm:$0xff]  ;;  %v530_v25 = vmov 0.0|0.0   ;;  %vm282_vm2 = vcmask 1043456  }
   0xe   :  { %58 = vperm.xlu0 %494, %v39_v9   ;;  %68 = vperm.xlu1 %495, %v41_v10   ;;  %v498_v13 = vld [vmem:[%s680_s1 + $0x8] sm:$0xff]   ;;  %v44_v15 = vld [vmem:[%s681_s2 + $0x30] sm:$0xff]  ;;  %v45_v16 = vld [vmem:[%s681_s2 + $0x38] sm:$0xff]  ;;  %vm278_vm3 = vcmask 818176   ;;  %s531_s10 = smov [#allocation3]   ;;  %vm356_vm4 = vcmask 57344  }
   0xf   :  { %v499_v14 = vld [vmem:[%s680_s1 + $0x28] sm:$0xff]   ;;  %v46_v17 = vld [vmem:[%s681_s2 + $0x40] sm:$0xff]  ;;  %v500_v19 = vld [vmem:[%s680_s1 + $0x10] sm:$0xff]   ;;  %469 = vmatprep.subr.bf16.mxu1 %v530_v25  ;;  %s364_s11 = sshll.u32 %s531_s10, 4  ;;  %s365_s11 = int_to_ptr.vmem [resolvable:$true] %s364_s11 }
  0x10   :  { %v47_v18 = vld [vmem:[%s681_s2 + $0x48] sm:$0xff]  ;;  %v501_v20 = vld [vmem:[%s680_s1 + $0x30] ss:$0 sps:$4 sm:$0x33]   ;;  %v49_v22 = vld [vmem:[%s681_s2 + $0x58] sm:$0xff]  ;;  %s503_s12 = scalar_lea.vmem %s365_s11, 16  ;;  %p508_p1 = scmp.lt.s32.totalorder %s365_s11, %s365_s11 }
  0x11   :  { %v48_v21 = vld [vmem:[%s681_s2 + $0x50] sm:$0xff]  ;;  %v50_v23 = vld [vmem:[%s681_s2 + $0x60] sm:$0xf]  ;;  %v502_v24 = vld [vmem:[%s680_s1 + $0x18] sm:$0xff]   ;;  %p504_p0 = scmp.ne.s32.totalorder %s365_s11, %s503_s12  ;;  %s507_s13 = scalar_lea.vmem %s365_s11, 32 }
  0x12   :  { %73 = vperm.xlu0 %494, %v42_v11   ;;  %78 = vperm.xlu1 %495, %v43_v12   ;;  %p509_p2 = scmp.lt.s32.totalorder %s507_s13, %s503_s12 }
  0x14   :  { %417 = vmatmul.mubr.msk.bf16.gmra.mrb[4].mxu0 %vm149_vm0, %v498_v13  ;;  %433 = vmatmul.mubr.msk.bf16.gmra.mrb[4].mxu1 %vm149_vm0, %v499_v14  ;;  %p510_p3 = por %p509_p2, %p508_p1 }
  0x15   :  { %420 = vmatprep.mubr.msk.bf16.mxu0 %vm528_vm1, %v527_v1  ;;  %436 = vmatprep.mubr.msk.bf16.mxu1 %vm528_vm1, %v527_v1 }
  0x16   :  { %83 = vperm.xlu0 %494, %v44_v15   ;;  %88 = vperm.xlu1 %495, %v45_v16   ;;  %p511_p4 = pnand %p510_p3, %p504_p0 }
  0x1a   :  { %93 = vperm.xlu0 %494, %v46_v17   ;;  %98 = vperm.xlu1 %495, %v47_v18  }
  0x1c   :  { %421 = vmatmul.mubr.msk.bf16.gmra.mrb[8].mxu0 %vm149_vm0, %v500_v19  ;;  %437 = vmatmul.mubr.msk.bf16.gmra.mrb[8].mxu1 %vm149_vm0, %v501_v20 }
  0x1d   :  { %424 = vmatprep.mubr.msk.bf16.mxu0 %vm528_vm1, %v527_v1  ;;  %466 = vmatprep.mubr.msk.f32.mxu1 %vm528_vm1, %v527_v1 }
  0x1e   :  { %103 = vperm.xlu0 %494, %v48_v21   ;;  %108 = vperm.xlu1 %495, %v49_v22  }
  0x22   :  { %113 = vperm.xlu0 %494, %v50_v23  }
  0x24   :  { %425 = vmatmul.mubr.msk.bf16.gmra.mrb[12].mxu0 %vm149_vm0, %v502_v24 }
  0x83   :  { %v64_v27 = vpop.permute.xlu1 %63 }
  0x85   :  { %v54_v26 = vpop.permute.xlu0 %53 }
  0x8d   :  { %v59_v28 = vpop.permute.xlu0 %58  ;;  %v69_v29 = vpop.permute.xlu1 %68 }
  0x91   :  { %v74_v30 = vpop.permute.xlu0 %73  ;;  %v79_v31 = vpop.permute.xlu1 %78 }
  0x95   :  { %v84_v32 = vpop.permute.xlu0 %83  ;;  %v652_v33 = vpop.permute.xlu1 %88 }
  0x99   :  { %v94_v34 = vpop.permute.xlu0 %93  ;;  %v99_v35 = vpop.permute.xlu1 %98 }
  0x9d   :  { %v104_v53 = vpop.permute.xlu0 %103  ;;  %v109_v55 = vpop.permute.xlu1 %108 }
  0xdf   :  { %v208_v36 = vpop.f32.mrb[0].mxu0  ;;  %v240_v37 = vpop.f32.mrb[0].mxu1 }
  0xe0   :  { %v209_v38 = vadd.f32 %v208_v36, %v54_v26  ;;  %v414_v39 = vpop.f32.mrb[1].mxu0  ;;  %v241_v40 = vadd.f32 %v240_v37, %v94_v34  ;;  %v430_v41 = vpop.f32.mrb[1].mxu1 }
  0xe1   :  { %v211_v42 = vpop.f32.mrb[2].mxu0  ;;  %v243_v43 = vpop.f32.mrb[2].mxu1 }
  0xe2   :  { %v212_v44 = vadd.f32 %v211_v42, %v59_v28  ;;  %v415_v45 = vpop.f32.mrb[3].mxu0  ;;  %v270_v46 = vmax.f32 %v241_v40, 0.0  ;;  %v244_v47 = vadd.f32 %v243_v43, %v99_v35  ;;  %v431_v48 = vpop.f32.mrb[3].mxu1  ;;  %v262_v49 = vmax.f32 %v209_v38, 0.0 }
  0xe3   :  { %v277_v38 = vstv %s683_s4 }
  0xe4   :  { %v263_v50 = vmax.f32 %v212_v44, 0.0  ;;  %v271_v51 = vmax.f32 %v244_v47, 0.0 }
  0xe6   :  { %v470_v52 = vpack.c.bf16 %v263_v50, %v262_v49  ;;  %v482_v54 = vpack.c.bf16 %v271_v51, %v270_v46 }
  0xe7   :  { %v216_v56 = vpop.f32.mrb[4].mxu0  ;;  %v248_v57 = vpop.f32.mrb[4].mxu1 }
  0xe8   :  { %v217_v58 = vadd.f32 %v216_v56, %v64_v27  ;;  %v249_v59 = vadd.f32 %v248_v57, %v104_v53  ;;  %v418_v60 = vpop.f32.mrb[5].mxu0  ;;  %v434_v61 = vpop.f32.mrb[5].mxu1  ;;  %471 = vmatpush3.bf16.msra.mxu1 %v470_v52 }
  0xe9   :  { %v219_v62 = vpop.f32.mrb[6].mxu0  ;;  %v251_v63 = vpop.f32.mrb[6].mxu1  ;;  %472 = vmatprep.subr.bf16.mxu1 %v530_v25 }
  0xea   :  { %v272_v0 = vmax.f32 %v249_v59, 0.0  ;;  %v220_v2 = vadd.f32 %v219_v62, %v69_v29  ;;  %v252_v3 = vadd.f32 %v251_v63, %v109_v55  ;;  %v419_v4 = vpop.f32.mrb[7].mxu0  ;;  %v435_v5 = vpop.f32.mrb[7].mxu1  ;;  %v264_v6 = vmax.f32 %v217_v58, 0.0 }
  0xec   :  { %v265_v7 = vmax.f32 %v220_v2, 0.0  ;;  %v273_v8 = vmax.f32 %v252_v3, 0.0 }
  0xee   :  { %v473_v9 = vpack.c.bf16 %v265_v7, %v264_v6  ;;  %v485_v10 = vpack.c.bf16 %v273_v8, %v272_v0 }
  0xef   :  { %v224_v11 = vpop.f32.mrb[8].mxu0  ;;  %v256_v12 = vpop.f32.mrb[8].mxu1 }
  0xf0   :  { %v225_v13 = vadd.f32 %v224_v11, %v74_v30  ;;  %v422_v14 = vpop.f32.mrb[9].mxu0  ;;  %474 = vmatpush3.bf16.msra.mxu1 %v473_v9  ;;  %v438_v15 = vpop.f32.mrb[9].mxu1 }
  0xf1   :  { %v227_v16 = vpop.f32.mrb[10].mxu0  ;;  %475 = vmatprep.subr.bf16.mxu1 %v530_v25  ;;  %v259_v17 = vpop.f32.mrb[10].mxu1 }
  0xf2   :  { %v228_v18 = vadd.f32 %v227_v16, %v79_v31  ;;  %v423_v19 = vpop.f32.mrb[11].mxu0  ;;  %v439_v20 = vpop.f32.mrb[11].mxu1  ;;  %v266_v21 = vmax.f32 %v225_v13, 0.0 }
  0xf3   :  { %v114_v31 = vpop.permute.xlu0 %113 }
  0xf4   :  { %v267_v22 = vmax.f32 %v228_v18, 0.0  ;;  %v257_v37 = vadd.f32 %v256_v12, %v114_v31 }
  0xf6   :  { %v476_v23 = vpack.c.bf16 %v267_v22, %v266_v21 }
  0xf7   :  { %v232_v24 = vpop.f32.mrb[12].mxu0 }
  0xf8   :  { %v233_v26 = vadd.f32 %v232_v24, %v84_v32  ;;  %v426_v27 = vpop.f32.mrb[13].mxu0  ;;  %477 = vmatpush3.bf16.msra.mxu1 %v476_v23  ;;  %v274_v32 = vmax.f32 %v257_v37, 0.0 }
  0xf9   :  { %v235_v28 = vpop.f32.mrb[14].mxu0  ;;  %478 = vmatprep.subr.bf16.mxu1 %v530_v25 }
  0xfa   :  { %v236_v29 = vadd.f32 %v235_v28, %v652_v33  ;;  %v427_v30 = vpop.f32.mrb[15].mxu0  ;;  %v268_v34 = vmax.f32 %v233_v26, 0.0  ;;  %v275_v33 = vld [vmem:[%s682_s3] sm:$0x1] }
  0xfc   :  { %v269_v35 = vmax.f32 %v236_v29, 0.0 }
  0xfe   :  { %v479_v36 = vpack.c.bf16 %v269_v35, %v268_v34 }
 0x100   :  { %480 = vmatpush3.bf16.msra.mxu1 %v479_v36 }
 0x101   :  { %481 = vmatprep.subr.bf16.mxu1 %v530_v25 }
 0x104   :  { %483 = vmatpush3.bf16.msra.mxu1 %v482_v54 }
 0x105   :  { %484 = vmatprep.subr.bf16.mxu1 %v530_v25 }
 0x108   :  { %486 = vmatpush3.bf16.msra.mxu1 %v485_v10 }
 0x109   :  { %464 = vmatprep.subr.mxu1 %v527_v1 }
 0x10c   :  { %465 = vmatpush3.msk.msra.mxu1 %vm282_vm2, %v274_v32 }
 0x10d   :  { %467 = vmatmul.mubr.msk.f32.vlgmr.msra.gmra.mrb[12].mxu1 %vm278_vm3, %v275_v33 }
 0x1e0   :  { %v352_v25 = vpop.f32.mrb[12].mxu1 }
 0x1e1   :  { %v353_v39 = vadd.f32 %v352_v25, %v277_v38  ;;  %v468_v40 = vpop.f32.mrb[13].mxu1 }
 0x1e3   :  { %357 = vst.msk [vmem:[#allocation3] sm:$0x1] %vm356_vm4, %v353_v39 }
 0x1e4   :  { %514 = shalt.err (!%p511_p4)
}
 0x1e5   :  { %s515_s4 = scalar_lea.hbm %s684_s5, 16 }
 0x1e6   :  { %p516_p5 = scmp.ne.s32.totalorder %s684_s5, %s515_s4  ;;  %p519_p6 = scmp.lt.u32.totalorder %s515_s4, %s684_s5 }
 0x1e8   :  { %p521_p7 = pnand %p519_p6, %p516_p5 }
 0x1ea   :  { %524 = shalt.err (!%p521_p7)
}
 0x1eb   :  { %367 = dma.vmem_to_hbm [thread:$0]  %s365_s11, 16, %s684_s5, [#allocation4]  }
 0x1ec   :  { %525 = dma.done.wait [#allocation4], 16  }
 0x1ed   :  { %526 = vsyncadd [#allocation4], 4294967280 }
 0x1ee   :  { %371 = vsyncpa [#allocation4], 1 }

</bundles_post_ra>
